<compile_context>
chip_gen: v6e
topology: v6e:2x2x1
jax: 0.10.0
libtpu: 0.0.40
codegen_flags: <defaults>
</compile_context>

<pallas_src>
import math

import jax
import jax.numpy as jnp
from jax.experimental import pallas as pl
from jax.experimental.pallas import tpu as pltpu


def _mlp_kernel(x_ref,
                w1_ref, t1_ref,
                w2_ref, t2_ref,
                w3_ref, t3_ref,
                w4_ref, b4_ref,
                o_ref):
    # x arrives in its native (TILE_B, d_in) layout; contract over the feature
    # axis so activations come out feature-major (features, TILE_B) with the
    # batch on the 128-lane axis.
    x = x_ref[...]                                                     # (T, d_in) f32

    # layer 1: Linear (BN scale folded into W) -> +shift -> ReLU  (Dropout = identity)
    h = jax.lax.dot_general(w1_ref[...], x,
                            dimension_numbers=(((1,), (1,)), ((), ())),
                            preferred_element_type=jnp.float32)       # (h1, T) f32
    h = jnp.maximum(h + t1_ref[...], 0.0)

    # layer 2 (activations stay f32: skip the bf16 cast passes, MXU has slack)
    h = jnp.dot(w2_ref[...], h, preferred_element_type=jnp.float32)   # (h2, T) f32
    h = jnp.maximum(h + t2_ref[...], 0.0)

    # layer 3
    h = jnp.dot(w3_ref[...], h, preferred_element_type=jnp.float32)   # (h3, T) f32
    h = jnp.maximum(h + t3_ref[...], 0.0)

    # output head Linear(h3, 1): VPU multiply + sublane (XLU) reduction,
    # lane-dense (1, T) result store.
    out = jnp.sum(h * w4_ref[...], axis=0, keepdims=True) + b4_ref[0]  # (1, T) f32
    o_ref[...] = out.astype(o_ref.dtype)


def mlp_forward(x, params, head, *, tile_b=16384):
    """x: (B, input_dim) f32.  Returns (B, 1) f32."""
    (w1, t1), (w2, t2), (w3, t3) = params
    w4, b4 = head
    B, d_in = x.shape

    # Batch tile: multiple of 128 (lane width).  Cap it so grid_b >= 2 whenever
    # B allows, so the "parallel" batch axis actually splits across v7x's two
    # TensorCores (no effect on v5e/v6e, which have a single TC).
    cap = pl.cdiv(B, 2 * 128) * 128
    tile_b = max(128, (min(tile_b, cap) // 128) * 128)
    grid_b = pl.cdiv(B, tile_b)   # ragged last tile is fine (no padding pre-pass)

    def resident(a):  # whole array, same block every grid step -> stays in VMEM
        return pl.BlockSpec(a.shape, lambda i: (0, 0))

    out = pl.pallas_call(
        _mlp_kernel,
        out_shape=jax.ShapeDtypeStruct((1, B), jnp.float32),
        grid=(grid_b,),
        in_specs=[
            pl.BlockSpec((tile_b, d_in), lambda i: (i, 0)),            # x tile (native layout)
            resident(w1), resident(t1),
            resident(w2), resident(t2),
            resident(w3), resident(t3),
            resident(w4),
            pl.BlockSpec(memory_space=pltpu.MemorySpace.SMEM),         # b4 scalar
        ],
        out_specs=pl.BlockSpec((1, tile_b), lambda i: (0, i)),
        compiler_params=pltpu.CompilerParams(
            dimension_semantics=("parallel",)),
    )(x, w1, t1, w2, t2, w3, t3, w4, b4)

    return out[0, :].reshape(B, 1)


def init_raw_params(key, input_dim, num_hidden_units, num_layers=3):
    """Deterministic synthetic parameters matching the PyTorch module's shapes."""
    dims = [input_dim, num_hidden_units]
    h = num_hidden_units
    for _ in range(num_layers - 1):
        h = int(h / 2)
        dims.append(h)

    hidden = []
    for i in range(num_layers):
        d_i, d_o = dims[i], dims[i + 1]
        key, kw, kb, kg, kbe, km, kv = jax.random.split(key, 7)
        bound = 1.0 / math.sqrt(d_i)
        w = jax.random.uniform(kw, (d_o, d_i), jnp.float32, -bound, bound)   # PyTorch layout
        b = jax.random.uniform(kb, (d_o,), jnp.float32, -bound, bound)
        gamma = 1.0 + 0.1 * jax.random.normal(kg, (d_o,), jnp.float32)
        beta = 0.1 * jax.random.normal(kbe, (d_o,), jnp.float32)
        r_mean = 0.1 * jax.random.normal(km, (d_o,), jnp.float32)
        r_var = 1.0 + 0.1 * jax.random.uniform(kv, (d_o,), jnp.float32)
        hidden.append((w, b, gamma, beta, r_mean, r_var))

    d_last = dims[-1]
    key, kw, kb = jax.random.split(key, 3)
    bound = 1.0 / math.sqrt(d_last)
    w_out = jax.random.uniform(kw, (d_last, 1), jnp.float32, -bound, bound)  # column layout
    b_out = jax.random.uniform(kb, (1,), jnp.float32, -bound, bound)
    return hidden, (w_out, b_out)


def prepare_params(raw_hidden, raw_head, eps=1e-5):
    """Fold linear bias + eval-mode BatchNorm1d into (scaled weight, shift column).

    The fold stays in f32 (no bf16 quantization of gamma/sqrt(var)); the weights
    are tiny and VMEM-resident, so f32 costs nothing.
    """
    params = []
    for (w, b, gamma, beta, r_mean, r_var) in raw_hidden:
        scale = gamma / jnp.sqrt(r_var + eps)
        w_fold = (w * scale[:, None]).astype(jnp.float32)            # (d_out, d_in)
        shift = ((b - r_mean) * scale + beta).reshape(-1, 1)         # (d_out, 1)
        params.append((w_fold, shift.astype(jnp.float32)))
    w_out, b_out = raw_head
    return params, (w_out.astype(jnp.float32), b_out.astype(jnp.float32))


def mlp_reference(x, params, head):
    """Pure-JAX f32 reference (HIGHEST matmul precision)."""
    (w1, t1), (w2, t2), (w3, t3) = params
    w4, b4 = head
    hp = jax.lax.Precision.HIGHEST
    h = x.T                                                          # (d_in, B)
    h = jnp.maximum(jnp.dot(w1, h, precision=hp) + t1, 0.0)
    h = jnp.maximum(jnp.dot(w2, h, precision=hp) + t2, 0.0)
    h = jnp.maximum(jnp.dot(w3, h, precision=hp) + t3, 0.0)
    out = jnp.sum(h * w4, axis=0, keepdims=True) + b4[0]
    return out.T                                                     # (B, 1)


if __name__ == "__main__":
    key = jax.random.PRNGKey(0)
    batch, input_dim, hidden, num_layers = 512, 16, 32, 3
    dropout_rate = 0.25  # eval mode -> identity

    kx, kp = jax.random.split(key)
    x = jax.random.normal(kx, (batch, input_dim), jnp.float32)
    raw_hidden, raw_head = init_raw_params(kp, input_dim, hidden, num_layers)
    params, head = prepare_params(raw_hidden, raw_head)

    # tile_b clamp -> 256 here, giving a 2-step "parallel" batch grid.
    out = mlp_forward(x, params, head)
    out = jax.block_until_ready(out)

    ref = mlp_reference(x, params, head)
    assert out.shape == (batch, 1), out.shape
    max_err = float(jnp.max(jnp.abs(out - ref)))
    # Tolerance covers worst-case single-pass-bf16 MXU rounding of f32 operands.
    assert jnp.allclose(out, ref, atol=3e-2, rtol=3e-2), max_err

    print("KERNEL_OK")
</pallas_src>

<mosaic_0001>
module attributes {stable_mosaic.version = 11 : i64} {
  func.func @_mlp_kernel(%arg0: i32, %arg1: memref<256x16xf32, #tpu.memory_space<vmem>>, %arg2: memref<32x16xf32, #tpu.memory_space<vmem>>, %arg3: memref<32x1xf32, #tpu.memory_space<vmem>>, %arg4: memref<16x32xf32, #tpu.memory_space<vmem>>, %arg5: memref<16x1xf32, #tpu.memory_space<vmem>>, %arg6: memref<8x16xf32, #tpu.memory_space<vmem>>, %arg7: memref<8x1xf32, #tpu.memory_space<vmem>>, %arg8: memref<8x1xf32, #tpu.memory_space<vmem>>, %arg9: memref<1xf32, #tpu.memory_space<smem>>, %arg10: memref<1x256xf32, #tpu.memory_space<vmem>>) attributes {dimension_semantics = [#tpu.dimension_semantics<parallel>], iteration_bounds = array<i64: 2>, scalar_prefetch = 0 : i64, scratch_operands = 0 : i64, tpu.core_type = #tpu.core_type<tc>, window_params = [{transform_indices = @transform_0, window_bounds = array<i64: 256, 16>}, {pipeline_mode = #tpu.pipeline_mode<synchronous>, transform_indices = @transform_1, window_bounds = array<i64: 32, 16>}, {pipeline_mode = #tpu.pipeline_mode<synchronous>, transform_indices = @transform_2, window_bounds = array<i64: 32, 1>}, {pipeline_mode = #tpu.pipeline_mode<synchronous>, transform_indices = @transform_3, window_bounds = array<i64: 16, 32>}, {pipeline_mode = #tpu.pipeline_mode<synchronous>, transform_indices = @transform_4, window_bounds = array<i64: 16, 1>}, {pipeline_mode = #tpu.pipeline_mode<synchronous>, transform_indices = @transform_5, window_bounds = array<i64: 8, 16>}, {pipeline_mode = #tpu.pipeline_mode<synchronous>, transform_indices = @transform_6, window_bounds = array<i64: 8, 1>}, {pipeline_mode = #tpu.pipeline_mode<synchronous>, transform_indices = @transform_7, window_bounds = array<i64: 8, 1>}, {transform_indices = @transform_8, window_bounds = array<i64: 1>}, {transform_indices = @transform_9, window_bounds = array<i64: 1, 256>}]} {
    %c0 = arith.constant 0 : index
    %c0_0 = arith.constant 0 : index
    %0 = vector.load %arg1[%c0, %c0_0] : memref<256x16xf32, #tpu.memory_space<vmem>>, vector<256x16xf32>
    %c0_1 = arith.constant 0 : index
    %c0_2 = arith.constant 0 : index
    %1 = vector.load %arg2[%c0_1, %c0_2] : memref<32x16xf32, #tpu.memory_space<vmem>>, vector<32x16xf32>
    %cst = arith.constant dense<0.000000e+00> : vector<32x256xf32>
    %2 = tpu.matmul %1, %0, %cst {dimension_numbers = #tpu.dot_dimension_numbers<[1], [1], [0], [0], [0, 0, 1, 0], [], []>} : vector<32x16xf32>, vector<256x16xf32>, vector<32x256xf32> -> vector<32x256xf32>
    %c0_3 = arith.constant 0 : index
    %c0_4 = arith.constant 0 : index
    %3 = vector.load %arg3[%c0_3, %c0_4] : memref<32x1xf32, #tpu.memory_space<vmem>>, vector<32x1xf32>
    %4 = vector.broadcast %3 : vector<32x1xf32> to vector<32x256xf32>
    %5 = arith.addf %2, %4 : vector<32x256xf32>
    %cst_5 = arith.constant 0.000000e+00 : f32
    %6 = vector.broadcast %cst_5 : f32 to vector<32x256xf32>
    %7 = arith.maximumf %5, %6 : vector<32x256xf32>
    %c0_6 = arith.constant 0 : index
    %c0_7 = arith.constant 0 : index
    %8 = vector.load %arg4[%c0_6, %c0_7] : memref<16x32xf32, #tpu.memory_space<vmem>>, vector<16x32xf32>
    %cst_8 = arith.constant dense<0.000000e+00> : vector<16x256xf32>
    %9 = tpu.matmul %8, %7, %cst_8 {dimension_numbers = #tpu.dot_dimension_numbers<[1], [0], [0], [1], [0, 0, 1, 1], [], []>} : vector<16x32xf32>, vector<32x256xf32>, vector<16x256xf32> -> vector<16x256xf32>
    %c0_9 = arith.constant 0 : index
    %c0_10 = arith.constant 0 : index
    %10 = vector.load %arg5[%c0_9, %c0_10] : memref<16x1xf32, #tpu.memory_space<vmem>>, vector<16x1xf32>
    %11 = vector.broadcast %10 : vector<16x1xf32> to vector<16x256xf32>
    %12 = arith.addf %9, %11 : vector<16x256xf32>
    %cst_11 = arith.constant 0.000000e+00 : f32
    %13 = vector.broadcast %cst_11 : f32 to vector<16x256xf32>
    %14 = arith.maximumf %12, %13 : vector<16x256xf32>
    %c0_12 = arith.constant 0 : index
    %c0_13 = arith.constant 0 : index
    %15 = vector.load %arg6[%c0_12, %c0_13] : memref<8x16xf32, #tpu.memory_space<vmem>>, vector<8x16xf32>
    %cst_14 = arith.constant dense<0.000000e+00> : vector<8x256xf32>
    %16 = tpu.matmul %15, %14, %cst_14 {dimension_numbers = #tpu.dot_dimension_numbers<[1], [0], [0], [1], [0, 0, 1, 1], [], []>} : vector<8x16xf32>, vector<16x256xf32>, vector<8x256xf32> -> vector<8x256xf32>
    %c0_15 = arith.constant 0 : index
    %c0_16 = arith.constant 0 : index
    %17 = vector.load %arg7[%c0_15, %c0_16] : memref<8x1xf32, #tpu.memory_space<vmem>>, vector<8x1xf32>
    %18 = vector.broadcast %17 : vector<8x1xf32> to vector<8x256xf32>
    %19 = arith.addf %16, %18 : vector<8x256xf32>
    %cst_17 = arith.constant 0.000000e+00 : f32
    %20 = vector.broadcast %cst_17 : f32 to vector<8x256xf32>
    %21 = arith.maximumf %19, %20 : vector<8x256xf32>
    %c0_18 = arith.constant 0 : index
    %c0_19 = arith.constant 0 : index
    %22 = vector.load %arg8[%c0_18, %c0_19] : memref<8x1xf32, #tpu.memory_space<vmem>>, vector<8x1xf32>
    %23 = vector.broadcast %22 : vector<8x1xf32> to vector<8x256xf32>
    %24 = arith.mulf %21, %23 : vector<8x256xf32>
    %cst_20 = arith.constant dense<0.000000e+00> : vector<256xf32>
    %25 = vector.multi_reduction <add>, %24, %cst_20 [0] : vector<8x256xf32> to vector<256xf32>
    %26 = vector.shape_cast %25 : vector<256xf32> to vector<1x256xf32>
    %c0_21 = arith.constant 0 : index
    %27 = memref.load %arg9[%c0_21] : memref<1xf32, #tpu.memory_space<smem>>
    %28 = vector.broadcast %27 : f32 to vector<1x256xf32>
    %29 = arith.addf %26, %28 : vector<1x256xf32>
    %c0_22 = arith.constant 0 : index
    %c0_23 = arith.constant 0 : index
    %30 = vector.load %arg10[%c0_22, %c0_23] : memref<1x256xf32, #tpu.memory_space<vmem>>, vector<1x256xf32>
    tpu.vector_store %arg10[%c0_22, %c0_23], %29 {strides = array<i32>} : memref<1x256xf32, #tpu.memory_space<vmem>>, vector<1x256xf32>,
    return
  }
  func.func @transform_0(%arg0: i32) -> (i32, i32) {
    %c0_i32 = arith.constant 0 : i32
    %c0_i32_0 = arith.constant 0 : i32
    return %arg0, %c0_i32 : i32, i32
  }
  func.func @transform_1(%arg0: i32) -> (i32, i32) {
    %c0_i32 = arith.constant 0 : i32
    %c0_i32_0 = arith.constant 0 : i32
    %c0_i32_1 = arith.constant 0 : i32
    return %c0_i32, %c0_i32_0 : i32, i32
  }
  func.func @transform_2(%arg0: i32) -> (i32, i32) {
    %c0_i32 = arith.constant 0 : i32
    %c0_i32_0 = arith.constant 0 : i32
    %c0_i32_1 = arith.constant 0 : i32
    return %c0_i32, %c0_i32_0 : i32, i32
  }
  func.func @transform_3(%arg0: i32) -> (i32, i32) {
    %c0_i32 = arith.constant 0 : i32
    %c0_i32_0 = arith.constant 0 : i32
    %c0_i32_1 = arith.constant 0 : i32
    return %c0_i32, %c0_i32_0 : i32, i32
  }
  func.func @transform_4(%arg0: i32) -> (i32, i32) {
    %c0_i32 = arith.constant 0 : i32
    %c0_i32_0 = arith.constant 0 : i32
    %c0_i32_1 = arith.constant 0 : i32
    return %c0_i32, %c0_i32_0 : i32, i32
  }
  func.func @transform_5(%arg0: i32) -> (i32, i32) {
    %c0_i32 = arith.constant 0 : i32
    %c0_i32_0 = arith.constant 0 : i32
    %c0_i32_1 = arith.constant 0 : i32
    return %c0_i32, %c0_i32_0 : i32, i32
  }
  func.func @transform_6(%arg0: i32) -> (i32, i32) {
    %c0_i32 = arith.constant 0 : i32
    %c0_i32_0 = arith.constant 0 : i32
    %c0_i32_1 = arith.constant 0 : i32
    return %c0_i32, %c0_i32_0 : i32, i32
  }
  func.func @transform_7(%arg0: i32) -> (i32, i32) {
    %c0_i32 = arith.constant 0 : i32
    %c0_i32_0 = arith.constant 0 : i32
    %c0_i32_1 = arith.constant 0 : i32
    return %c0_i32, %c0_i32_0 : i32, i32
  }
  func.func @transform_8(%arg0: i32) -> i32 {
    %c0_i32 = arith.constant 0 : i32
    %c0_i32_0 = arith.constant 0 : i32
    return %c0_i32 : i32
  }
  func.func @transform_9(%arg0: i32) -> (i32, i32) {
    %c0_i32 = arith.constant 0 : i32
    %c0_i32_0 = arith.constant 0 : i32
    return %c0_i32, %arg0 : i32, i32
  }
}

</mosaic_0001>

<bundles_post_ra>
// kernel: tpu_custom_call.1
= control target key start
LH: loop header
LB: loop body
LE: loop exit
PB: predicated region body
PF: predicated region fallthrough
CT: control target
= control target key end

     0   :  { %s1372_s0 = inlined_call_operand.vmem [shape: f32[512,16], index: 0, kind: input, shape index: {}]   ;;  %s1373_s1 = inlined_call_operand.vmem [shape: f32[32,16], index: 1, kind: input, shape index: {}]   ;;  %s1374_s2 = inlined_call_operand.vmem [shape: f32[32,1], index: 2, kind: input, shape index: {}]   ;;  %s1375_s3 = inlined_call_operand.vmem [shape: f32[16,32], index: 3, kind: input, shape index: {}]   ;;  %s1376_s4 = inlined_call_operand.vmem [shape: f32[16,1], index: 4, kind: input, shape index: {}]   ;;  %s1377_s5 = inlined_call_operand.vmem [shape: f32[8,16], index: 5, kind: input, shape index: {}]   ;;  %s1378_s6 = inlined_call_operand.vmem [shape: f32[8,1], index: 6, kind: input, shape index: {}]   ;;  %s1379_s7 = inlined_call_operand.vmem [shape: f32[8,1], index: 7, kind: input, shape index: {}]   ;;  %s1380_s8 = inlined_call_operand.<no memory space> [shape: f32[1], index: 8, kind: input, shape index: {}]   ;;  %s1381_s9 = inlined_call_operand.hbm [shape: f32[1,512], index: 9, kind: output, shape index: {}]  }
   0x1   :  { %14 = sst [smem:[#allocation2]] %s1380_s8 }
   0x2   :  { %15 = vsyncpa [#allocation4], 0 }
   0x3   :  { %17 = vsyncpa [#allocation4 + $0x1], 0  ;;  %s1162_s11 = smov 0   ;;  %s1164_s12 = smov 0  }
   0x4   :  { %s1166_s13 = smov 0   ;;  %s1168_s14 = smov 0  }
   0x5 LB: > { %s906_s8 = sadd.s32 4294967295, %s1103_s14   ;;  %s907_s15 = sadd.s32 4294967294, %s1103_s14   ;;  %s1103_s14 = sphi %s1168_s14, %s1387_s14   ;;  %s1099_s13 = sphi %s1166_s13, %s1386_s13   ;;  %s1095_s12 = sphi %s1164_s12, %s1385_s12   ;;  %s1091_s11 = sphi %s1162_s11, %s1384_s11  }
   0x6   : > { %s1185_s16 = sadd.s32 1, %s1103_s14   ;;  %s224_s17 = sadd.s32 1, %s1099_s13 }
   0x7   : > { %s221_s18 = ssub.s32 %s1103_s14, %s1185_s16  ;;  %p234_p0 = scmp.ne.s32.totalorder %s1099_s13, %s1095_s12 }
   0x8   : > { %p222_p1 = scmp.eq.s32.totalorder %s221_s18, 0  ;;  %p235_p2 = scmp.eq.s32.totalorder %s906_s8, 1 }
   0x9   : > { %p240_p3 = scmp.ne.s32.totalorder %s1095_s12, %s1091_s11  ;;  %p241_p4 = scmp.eq.s32.totalorder %s907_s15, 1 }
   0xa   : > { %s1195_s19 = scalar_select %p222_p1, %s1099_s13, %s224_s17  }
   0xb   : > { %p1197_p5 = por %p235_p2, %p234_p0  ;;  %p1201_p6 = por %p241_p4, %p240_p3 }
   0xc   : > { %p910_p7 = scmp.ge.s32.totalorder %s1103_s14, 1  ;;  %p292_p8 = scmp.lt.s32.totalorder %s1103_s14, 3 }
   0xe   : > { %p293_p9 = pnand %p910_p7, %p292_p8 }
   0xf   : > { %s1207_s22 = sshll.u32 (!%p293_p9), %s906_s8, 5  ;;  %s806_s8 = sld [smem:[#allocation2]] (!%p293_p9) }
  0x10   : > { %296 = sbr.rel (%p293_p9) target bundleno = 750 (0x2ee), region = 56  ;;  %p329_p10 = scmp.lt.s32.totalorder (!%p293_p9), %s1207_s22, 63 }
  0x11   : > { %s325_s15 = sand.u32 (!%p293_p9), 1, %s1095_s12   ;;  %s846_s26 = scalar_lea.hbm (!%p293_p9), %s1381_s9, %s1207_s22 }
  0x12   : > { %s834_s27 = scalar_lea.sflag (!%p293_p9), [#allocation4], %s325_s15 }
  0x15   : > { %vm395_vm0 = vcmask 130048   ;;  %v1212_v0 = vld [vmem:[%s1373_s1] sm:$0xff]  ;;  %v1105_v1 = vmov 0   ;;  %v372_v2 = vld [vmem:[%s1374_s2 + $0x8] sm:$0xff]  ;;  %v374_v3 = vld [vmem:[%s1374_s2 + $0x18] sm:$0xff]  ;;  %s330_s29 = scalar_select %p329_p10, %s1207_s22, 63 }
  0x16   : > { %991 = vmatprep.mubr.msk.f32.mxu0 %vm395_vm0, %v1212_v0  ;;  %1042 = vset.pattern.permute.xlu1 %v1105_v1  ;;  %v371_v4 = vld [vmem:[%s1374_s2] sm:$0xff]  ;;  %v373_v5 = vld [vmem:[%s1374_s2 + $0x10] sm:$0xff]  ;;  %v604_v10 = vld [vmem:[%s1376_s4 + $0x8] sm:$0xff]  ;;  %v1106_v45 = vmov 0.0   ;;  %vm615_vm1 = vcmask 261120  }
  0x17   : > { %382 = vperm.xlu1 %1042, %v372_v2   ;;  %1041 = vset.pattern.permute.xlu0 %v1105_v1  ;;  %s913_s17 = sshll.u32 %s330_s29, 3  ;;  %v603_v6 = vld [vmem:[%s1376_s4] sm:$0xff]  ;;  %v368_v42 = vld [vmem:[%s1373_s1 + $0x8] sm:$0xff]  ;;  %v369_v43 = vld [vmem:[%s1373_s1 + $0x10] sm:$0xff]  ;;  %s1108_s29 = smov [#allocation3]  }
  0x18   : > { %392 = vperm.xlu0 %1041, %v374_v3   ;;  %s1233_s24 = scalar_lea.vmem %s1372_s0, %s913_s17  ;;  %v786_v13 = vld [vmem:[%s1379_s7] sm:$0xff]  ;;  %v370_v44 = vld [vmem:[%s1373_s1 + $0x18] sm:$0xff]  ;;  %686 = vmatprep.mubr.f32.mxu1 %v1106_v45  ;;  %s911_s17 = sshll.u32 %s325_s15, 1 }
  0x19   : > { %v366_v7 = vld [vmem:[%s1233_s24 + $0xf8] sm:$0xff]  ;;  %v365_v9 = vld [vmem:[%s1233_s24 + $0xf0] sm:$0xff]  ;;  %v364_v12 = vld [vmem:[%s1233_s24 + $0xe8] sm:$0xff]  ;;  %s327_s18 = scalar_lea.vmem [#allocation3], %s911_s17  ;;  %s1047_s30 = sshll.u32 %s1108_s29, 4  ;;  %s1048_s30 = int_to_ptr.vmem [resolvable:$false] %s1047_s30 }
  0x1a   : > { %v350_v8 = vld [vmem:[%s1233_s24 + $0x78] sm:$0xff]  ;;  %959 = vmatprep.subr.msk.mxu0 %vm395_vm0, %v366_v7  ;;  %v349_v11 = vld [vmem:[%s1233_s24 + $0x70] sm:$0xff]  ;;  %v704_v14 = vld [vmem:[%s1378_s6] sm:$0xff]  ;;  %s848_s23 = sshll.u32 %s327_s18, 4  ;;  %s1049_s10 = scalar_lea.vmem %s1048_s30, 64  ;;  %s849_s23 = int_to_ptr.vmem [resolvable:$true] %s848_s23 }
  0x1b   : > { %377 = vperm.xlu1 %1042, %v371_v4   ;;  %960 = vmatpush3.xpose.msk.msra.mxu0 %vm395_vm0, %v350_v8  ;;  %v348_v15 = vld [vmem:[%s1233_s24 + $0x68] sm:$0xff]  ;;  %v363_v16 = vld [vmem:[%s1233_s24 + $0xe0] sm:$0xff]  ;;  %v362_v18 = vld [vmem:[%s1233_s24 + $0xd8] sm:$0xff]  ;;  %s1043_s28 = scalar_lea.vmem %s849_s23, 32  ;;  %p1050_p0 = scmp.lt.s32.totalorder %s849_s23, %s1048_s30 }
  0x1c   : > { %387 = vperm.xlu0 %1041, %v373_v5   ;;  %961 = vmatprep.subr.msk.mxu0 %vm395_vm0, %v365_v9  ;;  %v347_v17 = vld [vmem:[%s1233_s24 + $0x60] sm:$0xff]  ;;  %v346_v19 = vld [vmem:[%s1233_s24 + $0x58] sm:$0xff]  ;;  %v361_v20 = vld [vmem:[%s1233_s24 + $0xd0] sm:$0xff]  ;;  %p1044_p11 = scmp.ne.s32.totalorder %s849_s23, %s1043_s28  ;;  %p1051_p1 = scmp.lt.s32.totalorder %s1049_s10, %s1043_s28 }
  0x1d   : > { %v345_v21 = vld [vmem:[%s1233_s24 + $0x50] sm:$0xff]  ;;  %v360_v22 = vld [vmem:[%s1233_s24 + $0xc8] sm:$0xff]  ;;  %v359_v24 = vld [vmem:[%s1233_s24 + $0xc0] sm:$0xff] }
  0x1e   : > { %v344_v23 = vld [vmem:[%s1233_s24 + $0x48] sm:$0xff]  ;;  %v343_v25 = vld [vmem:[%s1233_s24 + $0x40] sm:$0xff]  ;;  %v358_v26 = vld [vmem:[%s1233_s24 + $0xb8] sm:$0xff]  ;;  %p1045_p12 = pnand %p1044_p11, %p1197_p5  ;;  %p1052_p2 = por %p1051_p1, %p1050_p0 }
  0x1f   : > { %607 = vperm.xlu1 %1042, %v603_v6   ;;  %962 = vmatpush3.xpose.msk.msra.mxu0 %vm395_vm0, %v349_v11  ;;  %v342_v27 = vld [vmem:[%s1233_s24 + $0x38] sm:$0xff]  ;;  %v357_v28 = vld [vmem:[%s1233_s24 + $0xb0] sm:$0xff]  ;;  %v356_v30 = vld [vmem:[%s1233_s24 + $0xa8] sm:$0xff] }
  0x20   : > { %612 = vperm.xlu0 %1041, %v604_v10   ;;  %963 = vmatprep.subr.msk.mxu0 %vm395_vm0, %v364_v12  ;;  %v341_v29 = vld [vmem:[%s1233_s24 + $0x30] sm:$0xff]  ;;  %v340_v31 = vld [vmem:[%s1233_s24 + $0x28] sm:$0xff]  ;;  %v355_v32 = vld [vmem:[%s1233_s24 + $0xa0] sm:$0xff]  ;;  %p1046_p13 = pneg %p1045_p12 }
  0x21   : > { %v339_v33 = vld [vmem:[%s1233_s24 + $0x20] sm:$0xff]  ;;  %v354_v34 = vld [vmem:[%s1233_s24 + $0x98] sm:$0xff]  ;;  %v353_v36 = vld [vmem:[%s1233_s24 + $0x90] sm:$0xff] }
  0x22   : > { %v338_v35 = vld [vmem:[%s1233_s24 + $0x18] sm:$0xff]  ;;  %v337_v37 = vld [vmem:[%s1233_s24 + $0x10] sm:$0xff]  ;;  %v352_v38 = vld [vmem:[%s1233_s24 + $0x88] sm:$0xff]  ;;  %p1053_p3 = pnand %p1052_p2, %p1046_p13 }
  0x23   : > { %789 = vperm.xlu1 %1042, %v786_v13   ;;  %964 = vmatpush3.xpose.msk.msra.mxu0 %vm395_vm0, %v348_v15  ;;  %v336_v39 = vld [vmem:[%s1233_s24 + $0x8] sm:$0xff]  ;;  %v351_v40 = vld [vmem:[%s1233_s24 + $0x80] sm:$0xff] }
  0x24   : > { %707 = vperm.xlu0 %1041, %v704_v14   ;;  %965 = vmatprep.subr.msk.mxu0 %vm395_vm0, %v363_v16  ;;  %v335_v41 = vld [vmem:[%s1233_s24] sm:$0xff]  ;;  %v602_v11 = vld [vmem:[%s1375_s3 + $0x8] sm:$0xff] }
  0x25   : > { %v601_v10 = vld [vmem:[%s1375_s3] sm:$0xff] }
  0x27   : > { %966 = vmatpush3.xpose.msk.msra.mxu0 %vm395_vm0, %v347_v17 }
  0x28   : > { %967 = vmatprep.subr.msk.mxu0 %vm395_vm0, %v362_v18 }
  0x2b   : > { %968 = vmatpush3.xpose.msk.msra.mxu0 %vm395_vm0, %v346_v19 }
  0x2c   : > { %969 = vmatprep.subr.msk.mxu0 %vm395_vm0, %v361_v20 }
  0x2f   : > { %970 = vmatpush3.xpose.msk.msra.mxu0 %vm395_vm0, %v345_v21 }
  0x30   : > { %971 = vmatprep.subr.msk.mxu0 %vm395_vm0, %v360_v22 }
  0x33   : > { %972 = vmatpush3.xpose.msk.msra.mxu0 %vm395_vm0, %v344_v23 }
  0x34   : > { %973 = vmatprep.subr.msk.mxu0 %vm395_vm0, %v359_v24 }
  0x37   : > { %974 = vmatpush3.xpose.msk.msra.mxu0 %vm395_vm0, %v343_v25 }
  0x38   : > { %975 = vmatprep.subr.msk.mxu0 %vm395_vm0, %v358_v26  ;;  %v703_v26 = vld [vmem:[%s1377_s5] sm:$0xff] }
  0x3b   : > { %976 = vmatpush3.xpose.msk.msra.mxu0 %vm395_vm0, %v342_v27 }
  0x3c   : > { %977 = vmatprep.subr.msk.mxu0 %vm395_vm0, %v357_v28 }
  0x3f   : > { %978 = vmatpush3.xpose.msk.msra.mxu0 %vm395_vm0, %v341_v29 }
  0x40   : > { %979 = vmatprep.subr.msk.mxu0 %vm395_vm0, %v356_v30 }
  0x43   : > { %980 = vmatpush3.xpose.msk.msra.mxu0 %vm395_vm0, %v340_v31 }
  0x44   : > { %981 = vmatprep.subr.msk.mxu0 %vm395_vm0, %v355_v32 }
  0x47   : > { %982 = vmatpush3.xpose.msk.msra.mxu0 %vm395_vm0, %v339_v33 }
  0x48   : > { %983 = vmatprep.subr.msk.mxu0 %vm395_vm0, %v354_v34 }
  0x4b   : > { %984 = vmatpush3.xpose.msk.msra.mxu0 %vm395_vm0, %v338_v35 }
  0x4c   : > { %985 = vmatprep.subr.msk.mxu0 %vm395_vm0, %v353_v36 }
  0x4f   : > { %986 = vmatpush3.xpose.msk.msra.mxu0 %vm395_vm0, %v337_v37 }
  0x50   : > { %987 = vmatprep.subr.msk.mxu0 %vm395_vm0, %v352_v38 }
  0x53   : > { %988 = vmatpush3.xpose.msk.msra.mxu0 %vm395_vm0, %v336_v39 }
  0x54   : > { %989 = vmatprep.subr.msk.mxu0 %vm395_vm0, %v351_v40 }
  0x57   : > { %990 = vmatpush3.xpose.msk.msra.mxu0 %vm395_vm0, %v335_v41 }
  0x5a   : > { %992 = vmatmul.mubr.msk.f32.vlgmr.msra.gmra.mxu0 %vm395_vm0, %v1212_v0 }
  0x5b   : > { %993 = vmatprep.mubr.msk.f32.mxu0 %vm395_vm0, %v368_v42 }
  0x5e   : > { %994 = vmatmul.mubr.msk.f32.gmra.mxu0 %vm395_vm0, %v368_v42 }
  0x5f   : > { %995 = vmatprep.mubr.msk.f32.mxu0 %vm395_vm0, %v369_v43 }
  0x62   : > { %996 = vmatmul.mubr.msk.f32.gmra.mxu0 %vm395_vm0, %v369_v43 }
  0x63   : > { %997 = vmatprep.mubr.msk.f32.mxu0 %vm395_vm0, %v370_v44 }
  0x66   : > { %998 = vmatmul.mubr.msk.f32.gmra.mxu0 %vm395_vm0, %v370_v44  ;;  %v1107_v44 = vmov 1966171168  }
  0x92   : > { %v383_v53 = vpop.permute.xlu1 %382 }
  0x93   : > { %v393_v50 = vpop.permute.xlu0 %392 }
  0x96   : > { %v378_v61 = vpop.permute.xlu1 %377 }
  0x97   : > { %v388_v55 = vpop.permute.xlu0 %387 }
  0x9a   : > { %v608_v16 = vpop.permute.xlu1 %607 }
  0x9b   : > { %v613_v15 = vpop.permute.xlu0 %612 }
  0x9e   : > { %v790_v33 = vpop.permute.xlu1 %789 }
  0x9f   : > { %v708_v27 = vpop.permute.xlu0 %707 }
 0x11a   : > { %v570_v46 = vpop.f32.mrf.mxu0 }
 0x11b   : > { %v571_v4 = vadd.f32 %v570_v46, %v378_v61  ;;  %v816_v46 = vlaneseq }
 0x11c   : > { %v572_v47 = vpop.f32.mrf.mxu0 }
 0x11d   : > { %v573_v2 = vadd.f32 %v572_v47, %v378_v61  ;;  %v593_v9 = vmax.f32 %v571_v4, 0.0  ;;  %vm830_vm2 = vcmp.lt.s32.totalorder %v816_v46, 256 }
 0x11e   : > { %v576_v48 = vpop.f32.mrf.mxu0 }
 0x11f   : > { %v577_v0 = vadd.f32 %v576_v48, %v383_v53  ;;  %v594_v8 = vmax.f32 %v573_v2, 0.0 }
 0x120   : > { %v578_v49 = vpop.f32.mrf.mxu0 }
 0x121   : > { %v579_v62 = vadd.f32 %v578_v49, %v383_v53  ;;  %v595_v7 = vmax.f32 %v577_v0, 0.0  ;;  %v807_v53 = vstv %s806_s8 }
 0x122   : > { %v582_v51 = vpop.f32.mrf.mxu0 }
 0x123   : > { %v583_v60 = vadd.f32 %v582_v51, %v388_v55  ;;  %v596_v6 = vmax.f32 %v579_v62, 0.0 }
 0x124   : > { %v584_v52 = vpop.f32.mrf.mxu0 }
 0x125   : > { %v585_v58 = vadd.f32 %v584_v52, %v388_v55  ;;  %v597_v5 = vmax.f32 %v583_v60, 0.0  ;;  %v817_v52 = vshrl.u32 %v816_v46, 7 }
 0x126   : > { %v588_v54 = vpop.f32.mrf.mxu0 }
 0x127   : > { %v589_v56 = vadd.f32 %v588_v54, %v393_v50  ;;  %v598_v3 = vmax.f32 %v585_v58, 0.0 }
 0x128   : > { %v590_v57 = vpop.f32.mrf.mxu0 }
 0x129   : > { %v591_v59 = vadd.f32 %v590_v57, %v393_v50  ;;  %v599_v1 = vmax.f32 %v589_v56, 0.0 }
 0x12b   : > { %v600_v63 = vmax.f32 %v591_v59, 0.0 }
 0x12d   : > { %646 = vmatprep.subr.mxu1 %v600_v63 }
 0x12e   : > { %647 = vmatpush1.msra.mxu1 %v599_v1 }
 0x12f   : > { %648 = vmatprep.subr.mxu1 %v598_v3 }
 0x130   : > { %649 = vmatpush1.msra.mxu1 %v597_v5 }
 0x131   : > { %650 = vmatprep.subr.mxu1 %v596_v6 }
 0x132   : > { %651 = vmatpush1.msra.mxu1 %v595_v7 }
 0x133   : > { %652 = vmatprep.subr.mxu1 %v594_v8 }
 0x134   : > { %653 = vmatpush1.msra.mxu1 %v593_v9 }
 0x135   : > { %950 = vmatmul.mubr.msk.f32.vlgmr.msra.gmra.mxu1 %vm615_vm1, %v601_v10 }
 0x136   : > { %692 = vmatprep.mubr.f32.mxu1 %v1106_v45 }
 0x139   : > { %951 = vmatmul.mubr.msk.f32.gmra.mxu1 %vm615_vm1, %v602_v11 }
 0x13a   : > { %777 = vmatprep.mubr.f32.mxu1 %v1106_v45  ;;  %v814_v45 = vunpack.c.l.s4 %v1107_v44 }
 0x13c   : > { %v815_v51 = vunpack.c.0.s8 %v814_v45 }
 0x13e   : > { %v818_v57 = vsub.s32 %v815_v51, %v817_v52 }
 0x1f5   : > { %v688_v12 = vpop.f32.mrf.mxu1 }
 0x1f6   : > { %v689_v21 = vadd.f32 %v688_v12, %v608_v16 }
 0x1f7   : > { %v690_v13 = vpop.f32.mrf.mxu1 }
 0x1f8   : > { %v691_v19 = vadd.f32 %v690_v13, %v608_v16  ;;  %v699_v25 = vmax.f32 %v689_v21, 0.0 }
 0x1f9   : > { %v694_v14 = vpop.f32.mrf.mxu1 }
 0x1fa   : > { %v695_v17 = vadd.f32 %v694_v14, %v613_v15  ;;  %v700_v24 = vmax.f32 %v691_v19, 0.0 }
 0x1fb   : > { %v696_v18 = vpop.f32.mrf.mxu1 }
 0x1fc   : > { %v697_v20 = vadd.f32 %v696_v18, %v613_v15  ;;  %v701_v23 = vmax.f32 %v695_v17, 0.0 }
 0x1fe   : > { %v702_v22 = vmax.f32 %v697_v20, 0.0 }
 0x200   : > { %741 = vmatprep.subr.mxu1 %v702_v22 }
 0x201   : > { %742 = vmatpush1.msra.mxu1 %v701_v23 }
 0x202   : > { %743 = vmatprep.subr.mxu1 %v700_v24 }
 0x203   : > { %744 = vmatpush1.msra.mxu1 %v699_v25 }
 0x204   : > { %952 = vmatmul.mubr.msk.f32.vlgmr.msra.gmra.mxu1 %vm395_vm0, %v703_v26 }
 0x2c4   : > { %v779_v28 = vpop.f32.mrf.mxu1 }
 0x2c5   : > { %v780_v29 = vadd.f32 %v779_v28, %v708_v27 }
 0x2c6   : > { %v781_v30 = vpop.f32.mrf.mxu1 }
 0x2c7   : > { %v784_v31 = vmax.f32 %v780_v29, 0.0  ;;  %v782_v32 = vadd.f32 %v781_v30, %v708_v27 }
 0x2c9   : > { %v792_v34 = vmul.f32 %v790_v33, %v784_v31  ;;  %v785_v35 = vmax.f32 %v782_v32, 0.0 }
 0x2cb   : > { %v794_v36 = vrot.slane %v792_v34, 4  ;;  %v793_v37 = vmul.f32 %v790_v33, %v785_v35 }
 0x2cd   : > { %v795_v38 = vadd.f32 %v794_v36, %v792_v34  ;;  %v800_v39 = vrot.slane %v793_v37, 4 }
 0x2cf   : > { %v796_v40 = vrot.slane %v795_v38, 2  ;;  %v801_v41 = vadd.f32 %v800_v39, %v793_v37 }
 0x2d1   : > { %v797_v42 = vadd.f32 %v796_v40, %v795_v38  ;;  %v802_v43 = vrot.slane %v801_v41, 2 }
 0x2d3   : > { %v798_v47 = vrot.slane %v797_v42, 1  ;;  %v803_v48 = vadd.f32 %v802_v43, %v801_v41 }
 0x2d5   : > { %v799_v49 = vadd.f32 %v798_v47, %v797_v42  ;;  %v804_v50 = vrot.slane %v803_v48, 1 }
 0x2d7   : > { %v805_v54 = vadd.f32 %v804_v50, %v803_v48  ;;  %v808_v55 = vadd.f32 %v807_v53, %v799_v49 }
 0x2d9   : > { %v809_v56 = vadd.f32 %v807_v53, %v805_v54 }
 0x2db   : > { %v812_v58 = vcombine.low %v808_v55, %v809_v56 }
 0x2dd   : > { %v819_v59 = vrot.slane %v812_v58, %v818_v57 }
 0x2df   : > { %v826_v60 = vrot.slane %v819_v59, %v818_v57 }
 0x2e1   : > { %832 = vst.msk [vmem:[%s327_s18] sm:$0x3] %vm830_vm2, %v826_v60 }
 0x2e2   : > { %1056 = shalt.err (!%p1053_p3)
}
 0x2e3   : > { %s1057_s8 = scalar_lea.hbm %s846_s26, 32  ;;  %s1061_s17 = scalar_lea.hbm %s1381_s9, 64 }
 0x2e4   : > { %p1058_p4 = scmp.ne.s32.totalorder %s846_s26, %s1057_s8  ;;  %p1062_p9 = scmp.lt.s32.totalorder %s846_s26, %s1381_s9 }
 0x2e5   : > { %p1063_p10 = scmp.lt.s32.totalorder %s1061_s17, %s1057_s8 }
 0x2e6   : > { %p1059_p7 = pnand %p1058_p4, %p1197_p5 }
 0x2e7   : > { %p1064_p11 = por %p1063_p10, %p1062_p9 }
 0x2e8   : > { %p1060_p8 = pneg %p1059_p7 }
 0x2ea   : > { %p1065_p12 = pnand %p1064_p11, %p1060_p8 }
 0x2ec   : > { %1068 = shalt.err (!%p1065_p12)
}
 0x2ed   : > { %999 = dma.vmem_to_hbm [thread:$0]  (%p1197_p5), %s849_s23, 32, %s846_s26, %s834_s27  }
 0x2ee PF: > { %p1005_p13 = scmp.ge.s32.totalorder %s1103_s14, 2  ;;  %s860_s25 = sand.u32 1, %s1091_s11  }
 0x2ef   : > { %s861_s28 = scalar_lea.sflag [#allocation4], %s860_s25 }
 0x2f0   : > { %p1002_p0 = pnand %p1005_p13, %p1201_p6 }
 0x2f2   : > { %p1003_p1 = pneg %p1002_p0 }
 0x2f4   : > { %1086 = dma.done.wait (%p1003_p1), %s861_s28, 32  }
 0x2f5   : > { %1088 = vsyncadd (%p1003_p1), %s861_s28, 4294967264  ;;  %p20_p2 = scmp.ge.s32.totalorder %s1185_s16, 4   ;;  %s1384_s11 = smov %s1095_s12 }
 0x2f6   : > { %s1385_s12 = smov %s1099_s13  ;;  %s1386_s13 = smov %s1195_s19 }
 0x2f7   : > { %s1387_s14 = smov %s1185_s16  ;;  %22 = sbr.rel (!%p20_p2) target bundleno = 5 (0x5), region = 91 }
 0x2fc   :  { %866 = vsyncpa [#allocation4], 1 }
 0x2fd   :  { %868 = vsyncpa [#allocation4 + $0x1], 1 }

</bundles_post_ra>
